<compile_context>
chip_gen: v7x
topology: tpu7x:2x2x1
jax: 0.10.0
libtpu: 0.0.40
codegen_flags: <defaults>
</compile_context>

<pallas_src>
import functools

import jax
import jax.numpy as jnp
from jax import lax
from jax.experimental import pallas as pl
from jax.experimental.pallas import tpu as pltpu


def _sbb_kernel(x_ref, w1_ref, w2_ref, w3_ref, w4_ref, b123_ref, b4_ref,
                o_ref, *, S, W, nb):
    """One grid step: nb whole images; channels on sublanes, S on lanes."""
    f32 = jnp.float32

    # Boundary masks (same for every image), computed once per block.
    pos = lax.broadcasted_iota(jnp.int32, (1, S), 1)    # position inside image
    col = pos % W                                       # position inside a row
    up_ok = pos >= W                                    # (h-1, w) exists
    dn_ok = pos < (S - W)                               # (h+1, w) exists
    lf_ok = col != 0                                    # (h, w-1) exists
    rt_ok = col != (W - 1)                              # (h, w+1) exists

    w1 = w1_ref[...]                                    # (Cm, Cin)
    w2u, w2c, w2d = w2_ref[0], w2_ref[1], w2_ref[2]     # (Cm, Cm) each
    w3l, w3c, w3r = w3_ref[0], w3_ref[1], w3_ref[2]     # (Cm, Cm) each
    w4 = w4_ref[...]                                    # (Cout, Cm)
    b1, b2, b3 = b123_ref[0], b123_ref[1], b123_ref[2]  # (Cm, 1) f32
    b4 = b4_ref[...]                                    # (Cout, 1) f32
    cd = w1.dtype                                       # MXU operand dtype

    for b in range(nb):                                 # nb is small & static
        x = x_ref[b]                                    # (Cin, S) in cd

        # ---- conv1: 1x1 + ReLU ------------------------------------------
        h = jnp.dot(w1, x, preferred_element_type=f32) + b1
        hc = jnp.maximum(h, 0.0).astype(cd)             # ReLU in f32, cast once

        # ---- conv2: (3,1) kernel, pad (1,0) + ReLU -----------------------
        # Neighbours along H are +/-W lanes away; pltpu.roll is a cyclic XLU
        # lane rotation (free slot), wrapped lanes are zeroed by the masks.
        up = jnp.where(up_ok, pltpu.roll(hc, W, 1), 0.0)        # value at (h-1,w)
        dn = jnp.where(dn_ok, pltpu.roll(hc, S - W, 1), 0.0)    # value at (h+1,w)
        h = (jnp.dot(w2u, up, preferred_element_type=f32)
             + jnp.dot(w2c, hc, preferred_element_type=f32)
             + jnp.dot(w2d, dn, preferred_element_type=f32) + b2)
        hc = jnp.maximum(h, 0.0).astype(cd)

        # ---- conv3: (1,3) kernel, pad (0,1) + ReLU -----------------------
        lf = jnp.where(lf_ok, pltpu.roll(hc, 1, 1), 0.0)        # value at (h,w-1)
        rt = jnp.where(rt_ok, pltpu.roll(hc, S - 1, 1), 0.0)    # value at (h,w+1)
        h = (jnp.dot(w3l, lf, preferred_element_type=f32)
             + jnp.dot(w3c, hc, preferred_element_type=f32)
             + jnp.dot(w3r, rt, preferred_element_type=f32) + b3)
        hc = jnp.maximum(h, 0.0).astype(cd)

        # ---- conv4: 1x1 ---------------------------------------------------
        out = jnp.dot(w4, hc, preferred_element_type=f32) + b4
        o_ref[b] = out.astype(o_ref.dtype)              # lane-dense store


def _vmem_capacity_bytes():
    """Per-core VMEM capacity; conservative (v7x = 64 MiB) if query fails."""
    try:
        cap = getattr(pltpu.get_tpu_info(), "vmem_capacity_bytes", None)
        if cap:
            return int(cap)
    except Exception:
        pass
    return 64 << 20


_MAX_IMAGES_PER_BLOCK = 8   # bounds in-kernel unrolling / code size


def _choose_images_per_block(N, S, per_image_io_bytes, fixed_bytes, budget):
    """Images per grid block.

    Constraints / preferences:
      * N % nb == 0 (block tiles the batch exactly; lane dim S is full-extent
        so stores stay legal for any S).
      * keep >= 2 grid steps when N >= 2 (both v7x TensorCores get work on the
        "parallel" axis, and input/output DMA double-buffering can overlap).
      * fit the per-block working set inside the VMEM budget.
      * prefer >= 2048 lanes of work per block to amortize ~0.35us/step.
    """
    cands = [d for d in range(1, N + 1)
             if N % d == 0 and d <= _MAX_IMAGES_PER_BLOCK]
    if N >= 2:
        two_step = [d for d in cands if N // d >= 2]
        if two_step:
            cands = two_step
    fits = [d for d in cands if fixed_bytes + d * per_image_io_bytes <= budget]
    if not fits:
        return 1
    big = [d for d in fits if d * S >= 2048]
    return min(big) if big else max(fits)


def pack_params(params, compute_dtype=jnp.float32):
    """Repack PyTorch-style conv weights ONCE (hoisted out of the call path)."""
    w1, b1, w2, b2, w3, b3, w4, b4 = params
    cd = compute_dtype
    Cm = w1.shape[1]
    Cout = w4.shape[1]
    w1t = jnp.transpose(w1).astype(cd)                   # (Cm, Cin)
    w2p = jnp.transpose(w2, (0, 2, 1)).astype(cd)        # (3, Cm_out, Cm_in)
    w3p = jnp.transpose(w3, (0, 2, 1)).astype(cd)        # (3, Cm_out, Cm_in)
    w4t = jnp.transpose(w4).astype(cd)                   # (Cout, Cm)
    b123 = jnp.stack([b1.reshape(Cm, 1), b2.reshape(Cm, 1),
                      b3.reshape(Cm, 1)], axis=0).astype(jnp.float32)
    b4c = b4.reshape(Cout, 1).astype(jnp.float32)
    return (w1t, w2p, w3p, w4t, b123, b4c)


def small_basic_block_pallas(x_nchw, packed, *, compute_dtype=jnp.float32,
                             out_dtype=None):
    """x_nchw: (N, Cin, H, W) -> (N, Cout, H, W).

    compute_dtype=jnp.bfloat16 feeds bf16 operands to the MXU (f32 accumulate),
    halves input HBM traffic and (by default) halves the dominant output
    stream too -- recommended on v6e/v7x.  VPU math stays in f32.
    out_dtype defaults to compute_dtype; pass jnp.float32 to force f32 output.
    """
    w1t, w2p, w3p, w4t, b123, b4c = packed
    N, Cin, H, Wd = x_nchw.shape
    S = H * Wd
    Cm = w1t.shape[0]
    Cout = w4t.shape[0]
    cd = compute_dtype
    od = cd if out_dtype is None else out_dtype

    # Free layout change: NCHW is already channel-major per image.
    x = x_nchw.reshape(N, Cin, S).astype(cd)

    cd_b = jnp.dtype(cd).itemsize
    od_b = jnp.dtype(od).itemsize

    # VMEM- and generation-aware block choice (+ explicit scoped-VMEM limit).
    per_img_io = 2 * S * (Cin * cd_b + Cout * od_b)          # double-buffered I/O
    per_img_scr = S * Cm * (4 * 4 + 6 * cd_b)                # live intermediates
    w_bytes = ((w1t.size + w2p.size + w3p.size + w4t.size) * cd_b
               + (b123.size + b4c.size) * 4)
    vmem_cap = _vmem_capacity_bytes()
    budget = min(int(vmem_cap * 0.4), 24 << 20)
    nb = _choose_images_per_block(N, S, per_img_io, per_img_scr + w_bytes, budget)
    est = per_img_scr + w_bytes + nb * per_img_io
    vmem_limit = int(min(max(2 * est, 32 << 20), int(0.9 * vmem_cap)))

    grid = (N // nb,)
    kernel = functools.partial(_sbb_kernel, S=S, W=Wd, nb=nb)

    def _const_spec(a):
        nd = a.ndim
        return pl.BlockSpec(a.shape, lambda i, _nd=nd: (0,) * _nd)

    flops = 2 * N * S * (Cm * Cin + 3 * Cm * Cm + 3 * Cm * Cm + Cout * Cm)
    bytes_acc = N * S * (Cin * cd_b + Cout * od_b) + w_bytes

    # TODO(synk): optionally try pipeline_mode=pl.Buffered(3) on the x spec for
    # v5e/v6e if profiling shows exposed input DMA (kept at 2 for v7x VMEM).
    out = pl.pallas_call(
        kernel,
        out_shape=jax.ShapeDtypeStruct((N, Cout, S), od),
        grid=grid,
        in_specs=[
            pl.BlockSpec((nb, Cin, S), lambda i: (i, 0, 0)),
            _const_spec(w1t), _const_spec(w2p), _const_spec(w3p),
            _const_spec(w4t), _const_spec(b123), _const_spec(b4c),
        ],
        out_specs=pl.BlockSpec((nb, Cout, S), lambda i: (i, 0, 0)),
        compiler_params=pltpu.CompilerParams(
            dimension_semantics=("parallel",),
            vmem_limit_bytes=vmem_limit),
        cost_estimate=pl.CostEstimate(
            flops=int(flops), transcendentals=0,
            bytes_accessed=int(bytes_acc)),
    )(x, w1t, w2p, w3p, w4t, b123, b4c)

    # Free reshape back to NCHW (no transpose needed).
    return out.reshape(N, Cout, H, Wd)


def init_params(key, ch_in, ch_out):
    cm = ch_out // 4
    ks = jax.random.split(key, 8)

    def rnd(k, shape):
        return jax.random.normal(k, shape, jnp.float32) * 0.1

    w1 = rnd(ks[0], (ch_in, cm));  b1 = rnd(ks[1], (1, cm))
    w2 = rnd(ks[2], (3, cm, cm));  b2 = rnd(ks[3], (1, cm))     # w2[k, cin, cout]
    w3 = rnd(ks[4], (3, cm, cm));  b3 = rnd(ks[5], (1, cm))     # w3[k, cin, cout]
    w4 = rnd(ks[6], (cm, ch_out)); b4 = rnd(ks[7], (1, ch_out))
    return (w1, b1, w2, b2, w3, b3, w4, b4)


def reference_jax(x_nchw, params):
    """Pure-JAX reference matching PyTorch Conv2d (NCHW) semantics."""
    w1, b1, w2, b2, w3, b3, w4, b4 = params
    dn = ("NCHW", "OIHW", "NCHW")

    def conv(x, w_oihw, b, pad):
        y = lax.conv_general_dilated(x, w_oihw, (1, 1), pad, dimension_numbers=dn)
        return y + b.reshape(1, -1, 1, 1)

    h = jax.nn.relu(conv(x_nchw, jnp.transpose(w1)[:, :, None, None], b1,
                         [(0, 0), (0, 0)]))
    h = jax.nn.relu(conv(h, jnp.transpose(w2, (2, 1, 0))[:, :, :, None], b2,
                         [(1, 1), (0, 0)]))
    h = jax.nn.relu(conv(h, jnp.transpose(w3, (2, 1, 0))[:, :, None, :], b3,
                         [(0, 0), (1, 1)]))
    return conv(h, jnp.transpose(w4)[:, :, None, None], b4, [(0, 0), (0, 0)])


if __name__ == "__main__":
    ch_in, ch_out = 4, 32
    N, H, W = 2, 16, 16

    key = jax.random.PRNGKey(0)
    kx, kp = jax.random.split(key)
    x = jax.random.normal(kx, (N, ch_in, H, W), jnp.float32)
    params = init_params(kp, ch_in, ch_out)

    ref = jax.block_until_ready(reference_jax(x, params))

    # Default f32 path (exact vs. the f32 reference).
    packed_f32 = pack_params(params, compute_dtype=jnp.float32)
    out = jax.block_until_ready(small_basic_block_pallas(x, packed_f32))
    assert out.shape == (N, ch_out, H, W), out.shape
    assert out.dtype == jnp.float32
    assert jnp.allclose(out, ref, rtol=1e-4, atol=1e-4), (
        float(jnp.max(jnp.abs(out - ref))))

    # bf16 compute + bf16 output path (recommended on v6e/v7x): halves both
    # HBM streams; same kernel, looser numeric check.
    packed_bf16 = pack_params(params, compute_dtype=jnp.bfloat16)
    out_bf16 = jax.block_until_ready(
        small_basic_block_pallas(x, packed_bf16, compute_dtype=jnp.bfloat16))
    assert out_bf16.dtype == jnp.bfloat16
    assert jnp.allclose(out_bf16.astype(jnp.float32), ref,
                        rtol=5e-2, atol=5e-2), (
        float(jnp.max(jnp.abs(out_bf16.astype(jnp.float32) - ref))))

    print("KERNEL_OK")
</pallas_src>

<mosaic_0001>
module attributes {stable_mosaic.version = 11 : i64} {
  func.func @_sbb_kernel(%arg0: i32, %arg1: memref<1x4x256xf32, #tpu.memory_space<vmem>>, %arg2: memref<8x4xf32, #tpu.memory_space<vmem>>, %arg3: memref<3x8x8xf32, #tpu.memory_space<vmem>>, %arg4: memref<3x8x8xf32, #tpu.memory_space<vmem>>, %arg5: memref<32x8xf32, #tpu.memory_space<vmem>>, %arg6: memref<3x8x1xf32, #tpu.memory_space<vmem>>, %arg7: memref<32x1xf32, #tpu.memory_space<vmem>>, %arg8: memref<1x32x256xf32, #tpu.memory_space<vmem>>) attributes {dimension_semantics = [#tpu.dimension_semantics<parallel>], iteration_bounds = array<i64: 2>, scalar_prefetch = 0 : i64, scratch_operands = 0 : i64, tpu.core_type = #tpu.core_type<tc>, window_params = [{transform_indices = @transform_0, window_bounds = array<i64: 1, 4, 256>}, {pipeline_mode = #tpu.pipeline_mode<synchronous>, transform_indices = @transform_1, window_bounds = array<i64: 8, 4>}, {pipeline_mode = #tpu.pipeline_mode<synchronous>, transform_indices = @transform_2, window_bounds = array<i64: 3, 8, 8>}, {pipeline_mode = #tpu.pipeline_mode<synchronous>, transform_indices = @transform_3, window_bounds = array<i64: 3, 8, 8>}, {pipeline_mode = #tpu.pipeline_mode<synchronous>, transform_indices = @transform_4, window_bounds = array<i64: 32, 8>}, {pipeline_mode = #tpu.pipeline_mode<synchronous>, transform_indices = @transform_5, window_bounds = array<i64: 3, 8, 1>}, {pipeline_mode = #tpu.pipeline_mode<synchronous>, transform_indices = @transform_6, window_bounds = array<i64: 32, 1>}, {transform_indices = @transform_7, window_bounds = array<i64: 1, 32, 256>}]} {
    %0 = tpu.iota {dimensions = array<i32: 1>} : vector<1x256xi32>
    %c16_i32 = arith.constant 16 : i32
    %c0_i32 = arith.constant 0 : i32
    %1 = arith.cmpi eq, %c16_i32, %c0_i32 : i32
    %c1_i32 = arith.constant 1 : i32
    %2 = arith.select %1, %c1_i32, %c16_i32 : i32
    %3 = vector.broadcast %2 : i32 to vector<1x256xi32>
    %4 = arith.remsi %0, %3 : vector<1x256xi32>
    %c0_i32_0 = arith.constant 0 : i32
    %5 = vector.broadcast %c0_i32_0 : i32 to vector<1x256xi32>
    %6 = arith.cmpi ne, %4, %5 : vector<1x256xi32>
    %c0_i32_1 = arith.constant 0 : i32
    %7 = vector.broadcast %c0_i32_1 : i32 to vector<1x256xi32>
    %8 = arith.cmpi slt, %4, %7 : vector<1x256xi32>
    %c0_i32_2 = arith.constant 0 : i32
    %9 = arith.cmpi slt, %2, %c0_i32_2 : i32
    %10 = vector.broadcast %9 : i1 to vector<1x256xi1>
    %11 = vector.broadcast %10 : vector<1x256xi1> to vector<1x256xi1>
    %12 = arith.xori %8, %11 : vector<1x256xi1>
    %13 = arith.andi %12, %6 : vector<1x256xi1>
    %14 = vector.broadcast %2 : i32 to vector<1x256xi32>
    %15 = arith.addi %4, %14 : vector<1x256xi32>
    %16 = arith.select %13, %15, %4 : vector<1x256xi1>, vector<1x256xi32>
    %c16_i32_3 = arith.constant 16 : i32
    %17 = vector.broadcast %c16_i32_3 : i32 to vector<1x256xi32>
    %18 = arith.cmpi sge, %0, %17 : vector<1x256xi32>
    %c240_i32 = arith.constant 240 : i32
    %19 = vector.broadcast %c240_i32 : i32 to vector<1x256xi32>
    %20 = arith.cmpi slt, %0, %19 : vector<1x256xi32>
    %c0_i32_4 = arith.constant 0 : i32
    %21 = vector.broadcast %c0_i32_4 : i32 to vector<1x256xi32>
    %22 = arith.cmpi ne, %16, %21 : vector<1x256xi32>
    %c15_i32 = arith.constant 15 : i32
    %23 = vector.broadcast %c15_i32 : i32 to vector<1x256xi32>
    %24 = arith.cmpi ne, %16, %23 : vector<1x256xi32>
    %c0 = arith.constant 0 : index
    %c0_5 = arith.constant 0 : index
    %25 = vector.load %arg2[%c0, %c0_5] : memref<8x4xf32, #tpu.memory_space<vmem>>, vector<8x4xf32>
    %c0_6 = arith.constant 0 : index
    %c0_7 = arith.constant 0 : index
    %c0_8 = arith.constant 0 : index
    %26 = vector.load %arg3[%c0_6, %c0_7, %c0_8] : memref<3x8x8xf32, #tpu.memory_space<vmem>>, vector<1x8x8xf32>
    %27 = vector.shape_cast %26 : vector<1x8x8xf32> to vector<8x8xf32>
    %c1 = arith.constant 1 : index
    %c0_9 = arith.constant 0 : index
    %c0_10 = arith.constant 0 : index
    %28 = vector.load %arg3[%c1, %c0_9, %c0_10] : memref<3x8x8xf32, #tpu.memory_space<vmem>>, vector<1x8x8xf32>
    %29 = vector.shape_cast %28 : vector<1x8x8xf32> to vector<8x8xf32>
    %c2 = arith.constant 2 : index
    %c0_11 = arith.constant 0 : index
    %c0_12 = arith.constant 0 : index
    %30 = vector.load %arg3[%c2, %c0_11, %c0_12] : memref<3x8x8xf32, #tpu.memory_space<vmem>>, vector<1x8x8xf32>
    %31 = vector.shape_cast %30 : vector<1x8x8xf32> to vector<8x8xf32>
    %c0_13 = arith.constant 0 : index
    %c0_14 = arith.constant 0 : index
    %c0_15 = arith.constant 0 : index
    %32 = vector.load %arg4[%c0_13, %c0_14, %c0_15] : memref<3x8x8xf32, #tpu.memory_space<vmem>>, vector<1x8x8xf32>
    %33 = vector.shape_cast %32 : vector<1x8x8xf32> to vector<8x8xf32>
    %c1_16 = arith.constant 1 : index
    %c0_17 = arith.constant 0 : index
    %c0_18 = arith.constant 0 : index
    %34 = vector.load %arg4[%c1_16, %c0_17, %c0_18] : memref<3x8x8xf32, #tpu.memory_space<vmem>>, vector<1x8x8xf32>
    %35 = vector.shape_cast %34 : vector<1x8x8xf32> to vector<8x8xf32>
    %c2_19 = arith.constant 2 : index
    %c0_20 = arith.constant 0 : index
    %c0_21 = arith.constant 0 : index
    %36 = vector.load %arg4[%c2_19, %c0_20, %c0_21] : memref<3x8x8xf32, #tpu.memory_space<vmem>>, vector<1x8x8xf32>
    %37 = vector.shape_cast %36 : vector<1x8x8xf32> to vector<8x8xf32>
    %c0_22 = arith.constant 0 : index
    %c0_23 = arith.constant 0 : index
    %38 = vector.load %arg5[%c0_22, %c0_23] : memref<32x8xf32, #tpu.memory_space<vmem>>, vector<32x8xf32>
    %c0_24 = arith.constant 0 : index
    %c0_25 = arith.constant 0 : index
    %c0_26 = arith.constant 0 : index
    %39 = vector.load %arg6[%c0_24, %c0_25, %c0_26] : memref<3x8x1xf32, #tpu.memory_space<vmem>>, vector<1x8x1xf32>
    %40 = vector.shape_cast %39 : vector<1x8x1xf32> to vector<8x1xf32>
    %c1_27 = arith.constant 1 : index
    %c0_28 = arith.constant 0 : index
    %c0_29 = arith.constant 0 : index
    %41 = vector.load %arg6[%c1_27, %c0_28, %c0_29] : memref<3x8x1xf32, #tpu.memory_space<vmem>>, vector<1x8x1xf32>
    %42 = vector.shape_cast %41 : vector<1x8x1xf32> to vector<8x1xf32>
    %c2_30 = arith.constant 2 : index
    %c0_31 = arith.constant 0 : index
    %c0_32 = arith.constant 0 : index
    %43 = vector.load %arg6[%c2_30, %c0_31, %c0_32] : memref<3x8x1xf32, #tpu.memory_space<vmem>>, vector<1x8x1xf32>
    %44 = vector.shape_cast %43 : vector<1x8x1xf32> to vector<8x1xf32>
    %c0_33 = arith.constant 0 : index
    %c0_34 = arith.constant 0 : index
    %45 = vector.load %arg7[%c0_33, %c0_34] : memref<32x1xf32, #tpu.memory_space<vmem>>, vector<32x1xf32>
    %c0_35 = arith.constant 0 : index
    %c0_36 = arith.constant 0 : index
    %c0_37 = arith.constant 0 : index
    %46 = vector.load %arg1[%c0_35, %c0_36, %c0_37] : memref<1x4x256xf32, #tpu.memory_space<vmem>>, vector<1x4x256xf32>
    %47 = vector.shape_cast %46 : vector<1x4x256xf32> to vector<4x256xf32>
    %cst = arith.constant dense<0.000000e+00> : vector<8x256xf32>
    %48 = tpu.matmul %25, %47, %cst {dimension_numbers = #tpu.dot_dimension_numbers<[1], [0], [0], [1], [0, 0, 1, 1], [], []>} : vector<8x4xf32>, vector<4x256xf32>, vector<8x256xf32> -> vector<8x256xf32>
    %49 = vector.broadcast %40 : vector<8x1xf32> to vector<8x256xf32>
    %50 = arith.addf %48, %49 : vector<8x256xf32>
    %cst_38 = arith.constant 0.000000e+00 : f32
    %51 = vector.broadcast %cst_38 : f32 to vector<8x256xf32>
    %52 = arith.maximumf %50, %51 : vector<8x256xf32>
    %c16_i32_39 = arith.constant 16 : i32
    %53 = tpu.dynamic_rotate %52 by %c16_i32_39 dim 1 : vector<8x256xf32>, i32 -> vector<8x256xf32>
    %cst_40 = arith.constant 0.000000e+00 : f32
    %54 = vector.shape_cast %18 : vector<1x256xi1> to vector<1x256xi1>
    %55 = vector.broadcast %54 : vector<1x256xi1> to vector<8x256xi1>
    %56 = vector.broadcast %cst_40 : f32 to vector<8x256xf32>
    %57 = arith.select %55, %53, %56 : vector<8x256xi1>, vector<8x256xf32>
    %c240_i32_41 = arith.constant 240 : i32
    %58 = tpu.dynamic_rotate %52 by %c240_i32_41 dim 1 : vector<8x256xf32>, i32 -> vector<8x256xf32>
    %cst_42 = arith.constant 0.000000e+00 : f32
    %59 = vector.shape_cast %20 : vector<1x256xi1> to vector<1x256xi1>
    %60 = vector.broadcast %59 : vector<1x256xi1> to vector<8x256xi1>
    %61 = vector.broadcast %cst_42 : f32 to vector<8x256xf32>
    %62 = arith.select %60, %58, %61 : vector<8x256xi1>, vector<8x256xf32>
    %cst_43 = arith.constant dense<0.000000e+00> : vector<8x256xf32>
    %63 = tpu.matmul %27, %57, %cst_43 {dimension_numbers = #tpu.dot_dimension_numbers<[1], [0], [0], [1], [0, 0, 1, 1], [], []>} : vector<8x8xf32>, vector<8x256xf32>, vector<8x256xf32> -> vector<8x256xf32>
    %cst_44 = arith.constant dense<0.000000e+00> : vector<8x256xf32>
    %64 = tpu.matmul %29, %52, %cst_44 {dimension_numbers = #tpu.dot_dimension_numbers<[1], [0], [0], [1], [0, 0, 1, 1], [], []>} : vector<8x8xf32>, vector<8x256xf32>, vector<8x256xf32> -> vector<8x256xf32>
    %65 = arith.addf %63, %64 : vector<8x256xf32>
    %cst_45 = arith.constant dense<0.000000e+00> : vector<8x256xf32>
    %66 = tpu.matmul %31, %62, %cst_45 {dimension_numbers = #tpu.dot_dimension_numbers<[1], [0], [0], [1], [0, 0, 1, 1], [], []>} : vector<8x8xf32>, vector<8x256xf32>, vector<8x256xf32> -> vector<8x256xf32>
    %67 = arith.addf %65, %66 : vector<8x256xf32>
    %68 = vector.broadcast %42 : vector<8x1xf32> to vector<8x256xf32>
    %69 = arith.addf %67, %68 : vector<8x256xf32>
    %cst_46 = arith.constant 0.000000e+00 : f32
    %70 = vector.broadcast %cst_46 : f32 to vector<8x256xf32>
    %71 = arith.maximumf %69, %70 : vector<8x256xf32>
    %c1_i32_47 = arith.constant 1 : i32
    %72 = tpu.dynamic_rotate %71 by %c1_i32_47 dim 1 : vector<8x256xf32>, i32 -> vector<8x256xf32>
    %cst_48 = arith.constant 0.000000e+00 : f32
    %73 = vector.shape_cast %22 : vector<1x256xi1> to vector<1x256xi1>
    %74 = vector.broadcast %73 : vector<1x256xi1> to vector<8x256xi1>
    %75 = vector.broadcast %cst_48 : f32 to vector<8x256xf32>
    %76 = arith.select %74, %72, %75 : vector<8x256xi1>, vector<8x256xf32>
    %c255_i32 = arith.constant 255 : i32
    %77 = tpu.dynamic_rotate %71 by %c255_i32 dim 1 : vector<8x256xf32>, i32 -> vector<8x256xf32>
    %cst_49 = arith.constant 0.000000e+00 : f32
    %78 = vector.shape_cast %24 : vector<1x256xi1> to vector<1x256xi1>
    %79 = vector.broadcast %78 : vector<1x256xi1> to vector<8x256xi1>
    %80 = vector.broadcast %cst_49 : f32 to vector<8x256xf32>
    %81 = arith.select %79, %77, %80 : vector<8x256xi1>, vector<8x256xf32>
    %cst_50 = arith.constant dense<0.000000e+00> : vector<8x256xf32>
    %82 = tpu.matmul %33, %76, %cst_50 {dimension_numbers = #tpu.dot_dimension_numbers<[1], [0], [0], [1], [0, 0, 1, 1], [], []>} : vector<8x8xf32>, vector<8x256xf32>, vector<8x256xf32> -> vector<8x256xf32>
    %cst_51 = arith.constant dense<0.000000e+00> : vector<8x256xf32>
    %83 = tpu.matmul %35, %71, %cst_51 {dimension_numbers = #tpu.dot_dimension_numbers<[1], [0], [0], [1], [0, 0, 1, 1], [], []>} : vector<8x8xf32>, vector<8x256xf32>, vector<8x256xf32> -> vector<8x256xf32>
    %84 = arith.addf %82, %83 : vector<8x256xf32>
    %cst_52 = arith.constant dense<0.000000e+00> : vector<8x256xf32>
    %85 = tpu.matmul %37, %81, %cst_52 {dimension_numbers = #tpu.dot_dimension_numbers<[1], [0], [0], [1], [0, 0, 1, 1], [], []>} : vector<8x8xf32>, vector<8x256xf32>, vector<8x256xf32> -> vector<8x256xf32>
    %86 = arith.addf %84, %85 : vector<8x256xf32>
    %87 = vector.broadcast %44 : vector<8x1xf32> to vector<8x256xf32>
    %88 = arith.addf %86, %87 : vector<8x256xf32>
    %cst_53 = arith.constant 0.000000e+00 : f32
    %89 = vector.broadcast %cst_53 : f32 to vector<8x256xf32>
    %90 = arith.maximumf %88, %89 : vector<8x256xf32>
    %cst_54 = arith.constant dense<0.000000e+00> : vector<32x256xf32>
    %91 = tpu.matmul %38, %90, %cst_54 {dimension_numbers = #tpu.dot_dimension_numbers<[1], [0], [0], [1], [0, 0, 1, 1], [], []>} : vector<32x8xf32>, vector<8x256xf32>, vector<32x256xf32> -> vector<32x256xf32>
    %92 = vector.broadcast %45 : vector<32x1xf32> to vector<32x256xf32>
    %93 = arith.addf %91, %92 : vector<32x256xf32>
    %c0_55 = arith.constant 0 : index
    %c0_56 = arith.constant 0 : index
    %c0_57 = arith.constant 0 : index
    %94 = vector.load %arg8[%c0_55, %c0_56, %c0_57] : memref<1x32x256xf32, #tpu.memory_space<vmem>>, vector<1x32x256xf32>
    %95 = vector.shape_cast %94 : vector<1x32x256xf32> to vector<32x256xf32>
    %96 = vector.shape_cast %93 : vector<32x256xf32> to vector<1x32x256xf32>
    tpu.vector_store %arg8[%c0_55, %c0_56, %c0_57], %96 {strides = array<i32>} : memref<1x32x256xf32, #tpu.memory_space<vmem>>, vector<1x32x256xf32>,
    return
  }
  func.func @transform_0(%arg0: i32) -> (i32, i32, i32) {
    %c0_i32 = arith.constant 0 : i32
    %c0_i32_0 = arith.constant 0 : i32
    %c0_i32_1 = arith.constant 0 : i32
    return %arg0, %c0_i32, %c0_i32_0 : i32, i32, i32
  }
  func.func @transform_1(%arg0: i32) -> (i32, i32) {
    %c0_i32 = arith.constant 0 : i32
    %c0_i32_0 = arith.constant 0 : i32
    %c0_i32_1 = arith.constant 0 : i32
    return %c0_i32, %c0_i32_0 : i32, i32
  }
  func.func @transform_2(%arg0: i32) -> (i32, i32, i32) {
    %c0_i32 = arith.constant 0 : i32
    %c0_i32_0 = arith.constant 0 : i32
    %c0_i32_1 = arith.constant 0 : i32
    %c0_i32_2 = arith.constant 0 : i32
    return %c0_i32, %c0_i32_0, %c0_i32_1 : i32, i32, i32
  }
  func.func @transform_3(%arg0: i32) -> (i32, i32, i32) {
    %c0_i32 = arith.constant 0 : i32
    %c0_i32_0 = arith.constant 0 : i32
    %c0_i32_1 = arith.constant 0 : i32
    %c0_i32_2 = arith.constant 0 : i32
    return %c0_i32, %c0_i32_0, %c0_i32_1 : i32, i32, i32
  }
  func.func @transform_4(%arg0: i32) -> (i32, i32) {
    %c0_i32 = arith.constant 0 : i32
    %c0_i32_0 = arith.constant 0 : i32
    %c0_i32_1 = arith.constant 0 : i32
    return %c0_i32, %c0_i32_0 : i32, i32
  }
  func.func @transform_5(%arg0: i32) -> (i32, i32, i32) {
    %c0_i32 = arith.constant 0 : i32
    %c0_i32_0 = arith.constant 0 : i32
    %c0_i32_1 = arith.constant 0 : i32
    %c0_i32_2 = arith.constant 0 : i32
    return %c0_i32, %c0_i32_0, %c0_i32_1 : i32, i32, i32
  }
  func.func @transform_6(%arg0: i32) -> (i32, i32) {
    %c0_i32 = arith.constant 0 : i32
    %c0_i32_0 = arith.constant 0 : i32
    %c0_i32_1 = arith.constant 0 : i32
    return %c0_i32, %c0_i32_0 : i32, i32
  }
  func.func @transform_7(%arg0: i32) -> (i32, i32, i32) {
    %c0_i32 = arith.constant 0 : i32
    %c0_i32_0 = arith.constant 0 : i32
    %c0_i32_1 = arith.constant 0 : i32
    return %arg0, %c0_i32, %c0_i32_0 : i32, i32, i32
  }
}

</mosaic_0001>

<bundles_post_ra>
// kernel: tpu_custom_call.1
= control target key start
LH: loop header
LB: loop body
LE: loop exit
PB: predicated region body
PF: predicated region fallthrough
CT: control target
= control target key end

     0   :  { %12 = vsyncpa [#allocation3], 0  ;;  %s1556_s0 = inlined_call_operand.vmem [shape: f32[2,4,256], index: 0, kind: input, shape index: {}]   ;;  %s1557_s1 = inlined_call_operand.vmem [shape: f32[8,4], index: 1, kind: input, shape index: {}]   ;;  %s1558_s2 = inlined_call_operand.vmem [shape: f32[3,8,8], index: 2, kind: input, shape index: {}]   ;;  %s1559_s3 = inlined_call_operand.vmem [shape: f32[3,8,8], index: 3, kind: input, shape index: {}]   ;;  %s1560_s4 = inlined_call_operand.vmem [shape: f32[32,8], index: 4, kind: input, shape index: {}]   ;;  %s1561_s5 = inlined_call_operand.vmem [shape: f32[3,8,1], index: 5, kind: input, shape index: {}]   ;;  %s1562_s6 = inlined_call_operand.vmem [shape: f32[32,1], index: 6, kind: input, shape index: {}]   ;;  %s1563_s7 = inlined_call_operand.hbm [shape: f32[2,32,256], index: 7, kind: output, shape index: {}]  }
   0x1   :  { %14 = vsyncpa [#allocation3 + $0x1], 0  ;;  %s1358_s24 = smov 0   ;;  %s1360_s25 = smov 0  }
   0x2   :  { %s1362_s26 = smov 0   ;;  %s1364_s27 = smov 0  }
   0x3 LB: > { %s1379_s28 = sadd.s32 4294967295, %s1308_s27   ;;  %s1150_s29 = sadd.s32 4294967294, %s1308_s27   ;;  %s1308_s27 = sphi %s1364_s27, %s1569_s27   ;;  %s1304_s26 = sphi %s1362_s26, %s1568_s26   ;;  %s1300_s25 = sphi %s1360_s25, %s1567_s25   ;;  %s1296_s24 = sphi %s1358_s24, %s1566_s24  }
   0x4   : > { %s1383_s30 = sadd.s32 1, %s1308_s27   ;;  %s179_s8 = sadd.s32 1, %s1304_s26 }
   0x5   : > { %s176_s9 = ssub.s32 %s1308_s27, %s1383_s30  ;;  %p189_p0 = scmp.ne.s32.totalorder %s1304_s26, %s1300_s25 }
   0x6   : > { %p177_p1 = scmp.eq.s32.totalorder %s176_s9, 0  ;;  %p190_p2 = scmp.eq.s32.totalorder %s1379_s28, 1 }
   0x7   : > { %p195_p3 = scmp.ne.s32.totalorder %s1300_s25, %s1296_s24  ;;  %p196_p4 = scmp.eq.s32.totalorder %s1150_s29, 1 }
   0x8   : > { %s1394_s10 = scalar_select %p177_p1, %s1304_s26, %s179_s8  }
   0x9   : > { %p1396_p5 = por %p190_p2, %p189_p0  ;;  %p1400_p6 = por %p196_p4, %p195_p3 }
   0xa   : > { %p1153_p7 = scmp.ge.s32.totalorder %s1308_s27, 1  ;;  %p240_p8 = scmp.lt.s32.totalorder %s1308_s27, 3 }
   0xc   : > { %p241_p9 = pnand %p1153_p7, %p240_p8 }
   0xd   : > { %p272_p10 = scmp.lt.s32.totalorder (!%p241_p9), %s1379_s28, 1  ;;  %v1310_v0 = vmov (!%p241_p9), 0.0   ;;  %v1311_v1 = vmov (!%p241_p9), 0   ;;  %v327_v2 = vld [vmem:[%s1561_s5] sm:$0xff] (!%p241_p9)  ;;  %vm348_vm0 = vcmask (!%p241_p9), 1043456   ;;  %vm344_vm1 = vcmask (!%p241_p9), 31744  }
   0xe   : > { %244 = sbr.rel (%p241_p9) target bundleno = 1179 (0x49b), region = 48  ;;  %417 = vmatprep.mubr.f32.mxu0 (!%p241_p9), %v1310_v0  ;;  %1243 = vset.pattern.permute.xlu0 (!%p241_p9), %v1311_v1  ;;  %v312_v5 = vld [vmem:[%s1557_s1] sm:$0xff] (!%p241_p9)  ;;  %s1312_s22 = smov (!%p241_p9), 16   ;;  %v1157_v13 = vld [vmem:[%s1558_s2 + $0x8] sm:$0xff] (!%p241_p9)  ;;  %vm452_vm2 = vcmask (!%p241_p9), 64512   ;;  %v277_v15 = vlaneseq (!%p241_p9)  ;;  %v1158_v27 = vld [vmem:[%s1558_s2 + $0x10] sm:$0xff] (!%p241_p9) }
   0xf   : > { %339 = vperm.xlu0 (!%p241_p9), %1243, %v327_v2   ;;  %594 = vmatprep.mubr.f32.mxu1 (!%p241_p9), %v1310_v0  ;;  %s1313_s8 = smov (!%p241_p9), 112   ;;  %v1161_v14 = vld [vmem:[%s1561_s5 + $0x8] sm:$0xff] (!%p241_p9)  ;;  %v313_v22 = vld [vmem:[%s1558_s2] sm:$0xff] (!%p241_p9)  ;;  %s1314_s18 = smov (!%p241_p9), 1   ;;  %v1162_v40 = vld [vmem:[%s1561_s5 + $0x10] sm:$0xff] (!%p241_p9) }
  0x10   : > { %1244 = vset.pattern.permute.xlu1 (!%p241_p9), %v1311_v1  ;;  %v1430_v16 = vand.u32 (!%p241_p9), 127, %v277_v15  ;;  %v1159_v39 = vld [vmem:[%s1559_s3 + $0x8] sm:$0xff] (!%p241_p9)  ;;  %s1315_s21 = smov (!%p241_p9), 127   ;;  %v332_v41 = vld [vmem:[%s1562_s6] sm:$0xff] (!%p241_p9)  ;;  %v334_v43 = vld [vmem:[%s1562_s6 + $0x10] sm:$0xff] (!%p241_p9)  ;;  %s1316_s14 = smov (!%p241_p9), [#allocation2]  }
  0x11   : > { %v333_v42 = vld [vmem:[%s1562_s6 + $0x8] sm:$0xff] (!%p241_p9)  ;;  %v335_v44 = vld [vmem:[%s1562_s6 + $0x18] sm:$0xff] (!%p241_p9)  ;;  %v318_v51 = vld [vmem:[%s1559_s3] sm:$0xff] (!%p241_p9) }
  0x12   : > { %vm430_vm3 = vcmp.lt.s32.totalorder (!%p241_p9), %v1430_v16, 16  ;;  %v1434_v18 = vadd.s32 (!%p241_p9), 128, %v1430_v16  ;;  %vm304_vm4 = vcmp.ge.s32.totalorder (!%p241_p9), %v1430_v16, 16  ;;  %vm443_vm5 = vcmp.lt.s32.totalorder (!%p241_p9), %v1430_v16, 112  ;;  %v1160_v56 = vld [vmem:[%s1559_s3 + $0x10] sm:$0xff] (!%p241_p9)  ;;  %v323_v1 = vld [vmem:[%s1560_s4] sm:$0xff] (!%p241_p9) }
  0x13   : > { %v284_v46 = vand.u32 (!%p241_p9), 15, %v1430_v16  ;;  %vm690_vm7 = vcmp.lt.s32.totalorder (!%p241_p9), %v1430_v16, 1  ;;  %vm703_vm10 = vcmp.lt.s32.totalorder (!%p241_p9), %v1430_v16, 127  ;;  %v324_v2 = vld [vmem:[%s1560_s4 + $0x8] sm:$0xff] (!%p241_p9) }
  0x14   : > { %vm307_vm6 = vcmp.lt.s32.totalorder (!%p241_p9), %v1434_v18, 240  ;;  %v291_v45 = vand.u32 (!%p241_p9), 15, %v1434_v18 }
  0x15   : > { %s273_s15 = scalar_select %p272_p10, %s1379_s28, 1  ;;  %vm308_vm9 = vcmp.ne.s32.totalorder %v284_v46, 0  ;;  %vm310_vm12 = vcmp.ne.s32.totalorder %v284_v46, 15 }
  0x16   : > { %vm309_vm8 = vcmp.ne.s32.totalorder %v291_v45, 0  ;;  %vm311_vm11 = vcmp.ne.s32.totalorder %v291_v45, 15 }
  0x17   : > { %s1187_s16 = sshll.u32 %s273_s15, 3  ;;  %s1250_s15 = sshll.u32 %s1316_s14, 4  ;;  %s1251_s15 = int_to_ptr.vmem [resolvable:$false] %s1250_s15 }
  0x18   : > { %s276_s19 = scalar_lea.vmem %s1556_s0, %s1187_s16  ;;  %s1252_s16 = scalar_lea.vmem %s1251_s15, 2048 }
  0x19   : > { %v336_v3 = vld [vmem:[%s276_s19] sm:$0xff] }
  0x1a   : > { %v343_v4 = vcombine.high %v336_v3, %v336_v3 }
  0x1c   : > { %1163 = vmatprep.subr.msk.mxu0 %vm348_vm0, %v343_v4  ;;  %v326_v4 = vld [vmem:[%s1560_s4 + $0x18] sm:$0xff] }
  0x1d   : > { %1164 = vmatpush1.msk.msra.mxu0 %vm348_vm0, %v336_v3  ;;  %v325_v3 = vld [vmem:[%s1560_s4 + $0x10] sm:$0xff] }
  0x1e   : > { %1165 = vmatmul.mubr.msk.f32.vlgmr.msra.gmra.mrb[0].mxu0 %vm344_vm1, %v312_v5 }
  0x1f   : > { %520 = vmatprep.mubr.f32.mxu0 %v1310_v0 }
  0x8e   : > { %v340_v6 = vpop.permute.xlu0 %339 }
  0xf1   : > { %v419_v7 = vpop.f32.mrb[0].mxu0 }
  0xf2   : > { %v420_v8 = vadd.f32 %v419_v7, %v340_v6  ;;  %v421_v9 = vpop.f32.mrb[1].mxu0 }
  0xf3   : > { %v422_v10 = vadd.f32 %v421_v9, %v340_v6 }
  0xf4   : > { %v424_v11 = vmax.f32 %v420_v8, 0.0 }
  0xf5   : > { %v425_v12 = vmax.f32 %v422_v10, 0.0 }
  0xf6   : > { %426 = vrot.lane.b32.xlu0 %v424_v11, %s1312_s22 }
  0xf7   : > { %428 = vrot.lane.b32.xlu1 %v425_v12, %s1312_s22  ;;  %456 = vmatprep.subr.mxu0 %v425_v12 }
  0xf8   : > { %457 = vmatpush1.msra.mxu0 %v424_v11 }
  0xf9   : > { %1166 = vmatmul.mubr.msk.f32.vlgmr.msra.gmra.mrb[2].mxu0 %vm452_vm2, %v1157_v13 }
  0xfa   : > { %441 = vrot.lane.b32.xlu0 %v425_v12, %s1313_s8  ;;  %779 = vmatprep.mubr.f32.mxu0 %v1310_v0 }
  0xfb   : > { %439 = vrot.lane.b32.xlu1 %v424_v11, %s1313_s8 }
  0xff   : > { %679 = vperm.xlu1 %1244, %v1161_v14  }
 0x168   : > { %v427_v17 = vpop.permute.xlu0 %426 }
 0x169   : > { %v429_v19 = vpop.permute.xlu1 %428 }
 0x16a   : > { %v431_v20 = vsel %vm430_vm3, %v427_v17, %v429_v19  ;;  %v432_v21 = vsel %vm430_vm3, %v429_v19, %v427_v17 }
 0x16b   : > { %530 = vmatprep.subr.mxu1 %v431_v20 }
 0x16c   : > { %1167 = vmatpush1.msk.msra.mxu1 %vm304_vm4, %v432_v21  ;;  %v442_v23 = vpop.permute.xlu0 %441 }
 0x16d   : > { %v440_v24 = vpop.permute.xlu1 %439  ;;  %1168 = vmatmul.mubr.msk.f32.vlgmr.msra.gmra.mrb[0].mxu1 %vm452_vm2, %v313_v22 }
 0x16e   : > { %v444_v25 = vsel %vm443_vm5, %v440_v24, %v442_v23  ;;  %v445_v26 = vsel %vm443_vm5, %v442_v23, %v440_v24  ;;  %668 = vmatprep.mubr.f32.mxu1 %v1310_v0 }
 0x16f   : > { %1169 = vmatprep.subr.msk.mxu1 %vm307_vm6, %v445_v26 }
 0x170   : > { %605 = vmatpush1.msra.mxu1 %v444_v25 }
 0x175   : > { %1170 = vmatmul.mubr.msk.f32.vlgmr.msra.gmra.mrb[0].mxu1 %vm452_vm2, %v1158_v27 }
 0x176   : > { %1041 = vmatprep.mubr.f32.mxu1 %v1310_v0 }
 0x17e   : > { %v680_v31 = vpop.permute.xlu1 %679 }
 0x1cc   : > { %v522_v28 = vpop.f32.mrb[2].mxu0 }
 0x1cd   : > { %v524_v29 = vpop.f32.mrb[3].mxu0 }
 0x248   : > { %v670_v30 = vpop.f32.mrb[0].mxu1 }
 0x249   : > { %v1189_v32 = vadd.f32 %v670_v30, %v522_v28  ;;  %v672_v33 = vpop.f32.mrb[1].mxu1 }
 0x24a   : > { %v1190_v34 = vadd.f32 %v672_v33, %v524_v29 }
 0x24b   : > { %v682_v35 = vadd.f32 %v1189_v32, %v680_v31 }
 0x24c   : > { %v683_v36 = vadd.f32 %v1190_v34, %v680_v31 }
 0x24d   : > { %v684_v37 = vmax.f32 %v682_v35, 0.0 }
 0x24e   : > { %v685_v38 = vmax.f32 %v683_v36, 0.0 }
 0x24f   : > { %686 = vrot.lane.b32.xlu0 %v684_v37, %s1314_s18 }
 0x250   : > { %688 = vrot.lane.b32.xlu1 %v685_v38, %s1314_s18  ;;  %715 = vmatprep.subr.mxu0 %v685_v38  ;;  %s269_s18 = sand.u32 1, %s1300_s25  }
 0x251   : > { %716 = vmatpush1.msra.mxu0 %v684_v37  ;;  %s1154_s19 = sshll.u32 %s269_s18, 6 }
 0x252   : > { %1171 = vmatmul.mubr.msk.f32.vlgmr.msra.gmra.mrb[4].mxu0 %vm452_vm2, %v1159_v39  ;;  %s271_s20 = scalar_lea.vmem [#allocation2], %s1154_s19 }
 0x253   : > { %699 = vrot.lane.b32.xlu0 %v684_v37, %s1315_s21  ;;  %853 = vmatprep.mubr.f32.mxu0 %v1310_v0  ;;  %s1088_s23 = sshll.u32 %s271_s20, 4  ;;  %s1510_s23 = int_to_ptr.vmem [resolvable:$true] %s1088_s23 }
 0x254   : > { %701 = vrot.lane.b32.xlu1 %v685_v38, %s1315_s21  ;;  %s1188_s21 = sshll.u32 %s1379_s28, 10  ;;  %s1514_s28 = scalar_lea.sflag [#allocation3], %s269_s18 }
 0x255   : > { %s1508_s9 = scalar_lea.hbm %s1563_s7, %s1188_s21  ;;  %s1246_s13 = scalar_lea.vmem %s1510_s23, 1024 }
 0x256   : > { %p1247_p11 = scmp.ne.s32.totalorder %s1510_s23, %s1246_s13  ;;  %p1253_p0 = scmp.lt.s32.totalorder %s1510_s23, %s1251_s15 }
 0x257   : > { %938 = vperm.xlu0 %1243, %v1162_v40   ;;  %p1254_p1 = scmp.lt.s32.totalorder %s1252_s16, %s1246_s13 }
 0x258   : > { %947 = vperm.xlu1 %1244, %v332_v41   ;;  %p1248_p12 = pnand %p1247_p11, %p1396_p5 }
 0x259   : > { %p1255_p2 = por %p1254_p1, %p1253_p0 }
 0x25a   : > { %p1249_p13 = pneg %p1248_p12 }
 0x25b   : > { %952 = vperm.xlu0 %1243, %v333_v42  }
 0x25c   : > { %957 = vperm.xlu1 %1244, %v334_v43   ;;  %p1256_p3 = pnand %p1255_p2, %p1249_p13 }
 0x25f   : > { %962 = vperm.xlu0 %1243, %v335_v44  }
 0x2c1   : > { %v687_v47 = vpop.permute.xlu0 %686 }
 0x2c2   : > { %v689_v48 = vpop.permute.xlu1 %688 }
 0x2c3   : > { %v691_v49 = vsel %vm690_vm7, %v687_v47, %v689_v48  ;;  %v692_v50 = vsel %vm690_vm7, %v689_v48, %v687_v47 }
 0x2c4   : > { %1172 = vmatprep.subr.msk.mxu0 %vm309_vm8, %v691_v49 }
 0x2c5   : > { %v700_v52 = vpop.permute.xlu0 %699  ;;  %1173 = vmatpush1.msk.msra.mxu0 %vm308_vm9, %v692_v50 }
 0x2c6   : > { %v702_v53 = vpop.permute.xlu1 %701  ;;  %1174 = vmatmul.mubr.msk.f32.vlgmr.msra.gmra.mrb[4].mxu0 %vm452_vm2, %v318_v51 }
 0x2c7   : > { %v704_v54 = vsel %vm703_vm10, %v700_v52, %v702_v53  ;;  %v705_v55 = vsel %vm703_vm10, %v702_v53, %v700_v52  ;;  %927 = vmatprep.mubr.f32.mxu0 %v1310_v0 }
 0x2c8   : > { %1175 = vmatprep.subr.msk.mxu0 %vm311_vm11, %v705_v55 }
 0x2c9   : > { %1176 = vmatpush1.msk.msra.mxu0 %vm310_vm12, %v704_v54 }
 0x2ce   : > { %1177 = vmatmul.mubr.msk.f32.vlgmr.msra.gmra.mrb[4].mxu0 %vm452_vm2, %v1160_v56 }
 0x2d6   : > { %v939_v57 = vpop.permute.xlu0 %938 }
 0x2d7   : > { %v948_v5 = vpop.permute.xlu1 %947 }
 0x2da   : > { %v953_v10 = vpop.permute.xlu0 %952 }
 0x2db   : > { %v958_v14 = vpop.permute.xlu1 %957 }
 0x2de   : > { %v963_v19 = vpop.permute.xlu0 %962 }
 0x3a1   : > { %v929_v58 = vpop.f32.mrb[4].mxu0 }
 0x3a2   : > { %v941_v59 = vadd.f32 %v939_v57, %v929_v58  ;;  %v931_v60 = vpop.f32.mrb[5].mxu0 }
 0x3a3   : > { %v942_v61 = vadd.f32 %v939_v57, %v931_v60 }
 0x3a4   : > { %v943_v63 = vmax.f32 %v941_v59, 0.0 }
 0x3a5   : > { %v944_v62 = vmax.f32 %v942_v61, 0.0 }
 0x3a7   : > { %977 = vmatprep.subr.mxu1 %v944_v62 }
 0x3a8   : > { %978 = vmatpush1.msra.mxu1 %v943_v63 }
 0x3a9   : > { %1178 = vmatmul.mubr.msk.f32.vlgmr.msra.gmra.mrb[2].mxu1 %vm452_vm2, %v323_v1 }
 0x3aa   : > { %1047 = vmatprep.mubr.f32.mxu1 %v1310_v0 }
 0x3ad   : > { %1179 = vmatmul.mubr.msk.f32.gmra.mrb[4].mxu1 %vm452_vm2, %v324_v2 }
 0x3ae   : > { %1053 = vmatprep.mubr.f32.mxu1 %v1310_v0 }
 0x3b1   : > { %1180 = vmatmul.mubr.msk.f32.gmra.mrb[6].mxu1 %vm452_vm2, %v325_v3 }
 0x3b2   : > { %1059 = vmatprep.mubr.f32.mxu1 %v1310_v0 }
 0x3b5   : > { %1181 = vmatmul.mubr.msk.f32.gmra.mrb[8].mxu1 %vm452_vm2, %v326_v4 }
 0x47c   : > { %v1043_v6 = vpop.f32.mrb[2].mxu1 }
 0x47d   : > { %v1044_v7 = vadd.f32 %v1043_v6, %v948_v5  ;;  %v1045_v8 = vpop.f32.mrb[3].mxu1 }
 0x47e   : > { %v1046_v9 = vadd.f32 %v1045_v8, %v948_v5 }
 0x47f   : > { %1066 = vst [vmem:[%s271_s20] sm:$0xff] %v1044_v7 }
 0x480   : > { %1067 = vst [vmem:[%s271_s20 + $0x8] sm:$0xff] %v1046_v9  ;;  %v1049_v0 = vpop.f32.mrb[4].mxu1 }
 0x481   : > { %v1050_v11 = vadd.f32 %v1049_v0, %v953_v10  ;;  %v1051_v12 = vpop.f32.mrb[5].mxu1 }
 0x482   : > { %v1052_v13 = vadd.f32 %v1051_v12, %v953_v10 }
 0x483   : > { %1068 = vst [vmem:[%s271_s20 + $0x10] sm:$0xff] %v1050_v11 }
 0x484   : > { %1069 = vst [vmem:[%s271_s20 + $0x18] sm:$0xff] %v1052_v13  ;;  %v1055_v15 = vpop.f32.mrb[6].mxu1 }
 0x485   : > { %v1056_v16 = vadd.f32 %v1055_v15, %v958_v14  ;;  %v1057_v17 = vpop.f32.mrb[7].mxu1 }
 0x486   : > { %v1058_v18 = vadd.f32 %v1057_v17, %v958_v14 }
 0x487   : > { %1070 = vst [vmem:[%s271_s20 + $0x20] sm:$0xff] %v1056_v16 }
 0x488   : > { %1071 = vst [vmem:[%s271_s20 + $0x28] sm:$0xff] %v1058_v18  ;;  %v1061_v20 = vpop.f32.mrb[8].mxu1 }
 0x489   : > { %v1062_v21 = vadd.f32 %v1061_v20, %v963_v19  ;;  %v1063_v22 = vpop.f32.mrb[9].mxu1 }
 0x48a   : > { %v1064_v23 = vadd.f32 %v1063_v22, %v963_v19 }
 0x48b   : > { %1072 = vst [vmem:[%s271_s20 + $0x30] sm:$0xff] %v1062_v21 }
 0x48c   : > { %1073 = vst [vmem:[%s271_s20 + $0x38] sm:$0xff] %v1064_v23 }
 0x48d   : > { %1259 = shalt.err (!%p1256_p3)
}
 0x48e   : > { %s1260_s17 = scalar_lea.hbm %s1508_s9, 1024  ;;  %s1264_s20 = scalar_lea.hbm %s1563_s7, 2048 }
 0x48f   : > { %p1261_p4 = scmp.ne.s32.totalorder %s1508_s9, %s1260_s17  ;;  %p1265_p9 = scmp.lt.u32.totalorder %s1508_s9, %s1563_s7 }
 0x490   : > { %p1266_p10 = scmp.lt.u32.totalorder %s1264_s20, %s1260_s17  ;;  %p1268_p12 = scmp.lt.u32.totalorder %s1260_s17, %s1508_s9 }
 0x491   : > { %p1262_p7 = pnand %p1261_p4, %p1396_p5 }
 0x492   : > { %p1267_p11 = por %p1266_p10, %p1265_p9 }
 0x493   : > { %p1263_p8 = pneg %p1262_p7 }
 0x494   : > { %p1269_p13 = por %p1268_p12, %p1267_p11 }
 0x496   : > { %p1270_p0 = pnand %p1269_p13, %p1263_p8 }
 0x498   : > { %1273 = shalt.err (!%p1270_p0)
}
 0x499   : > { %s1317_s8 = smov 256  }
 0x49a   : > { %1197 = dma.vmem_to_hbm [thread:$0]  (%p1396_p5), %s1510_s23, 1024, %s1508_s9, %s1514_s28, %s1317_s8, %s1317_s8, %s1312_s22  }
 0x49b PF: > { %p1203_p1 = scmp.ge.s32.totalorder %s1308_s27, 2  ;;  %s1103_s13 = sand.u32 1, %s1296_s24  }
 0x49c   : > { %s1104_s14 = scalar_lea.sflag [#allocation3], %s1103_s13 }
 0x49d   : > { %p1200_p2 = pnand %p1203_p1, %p1400_p6 }
 0x49f   : > { %1291 = dma.done.wait (!%p1200_p2), %s1104_s14, 1024  }
 0x4a0   : > { %1293 = vsyncadd (!%p1200_p2), %s1104_s14, 4294966272  ;;  %p17_p3 = scmp.ge.s32.totalorder %s1383_s30, 4   ;;  %s1566_s24 = smov %s1300_s25 }
 0x4a1   : > { %s1567_s25 = smov %s1304_s26  ;;  %s1568_s26 = smov %s1394_s10 }
 0x4a2   : > { %s1569_s27 = smov %s1383_s30  ;;  %19 = sbr.rel (!%p17_p3) target bundleno = 3 (0x3), region = 89 }
 0x4a9   :  { %1109 = vsyncpa [#allocation3], 1 }
 0x4aa   :  { %1111 = vsyncpa [#allocation3 + $0x1], 1 }

</bundles_post_ra>
